<compile_context>
chip_gen: v7x
topology: tpu7x:2x2x1
jax: 0.10.0
libtpu: 0.0.40
codegen_flags: <defaults>
</compile_context>

<pallas_src>
import jax
import jax.numpy as jnp
from jax import lax
from jax.experimental import pallas as pl
from jax.experimental.pallas import tpu as pltpu


def _landmark_head_kernel(x_ref, w_ref, b_ref, o_ref):
    # x_ref: (Cin, t_hw)   w_ref: (Cout, Cin)   b_ref: (1, Cout)
    # o_ref: (t_hw, Cout)  -- NHWC-ordered block, no post-kernel transpose.
    # Transposed-LHS contraction: (Cin, t_hw)^T @ (Cout, Cin)^T -> (t_hw, Cout)
    acc = lax.dot_general(
        x_ref[...], w_ref[...],
        dimension_numbers=(((0,), (1,)), ((), ())),
        preferred_element_type=jnp.float32)
    o_ref[...] = (acc + b_ref[...]).astype(o_ref.dtype)


def _pick_hw_tile(hw, n_batch, max_hw_tile):
    """Pick the spatial tile (lane axis of the input block)."""
    if hw <= max_hw_tile:
        if n_batch == 1 and hw > 128:
            # v7x has 2 TensorCores; a (1, 1) grid leaves one idle.  Split the
            # image into 2 multiple-of-128 tiles so the parallel grid has >= 2
            # blocks (near-zero cost on v5e/v6e, ~2x on v7x for N=1).
            return ((pl.cdiv(hw, 2) + 127) // 128) * 128
        return hw  # whole-image block (full extent -> always layout-legal)
    # Largest multiple-of-128 tile; pl.cdiv grid + masked tail block.
    return max(128, (max_hw_tile // 128) * 128)


def landmark_head_forward(x_nchw, weight, bias, num_anchors=3, max_hw_tile=8192):
    """x_nchw: (N, Cin, H, W); weight: (Cout, Cin) or (Cout, Cin, 1, 1);
    bias: (Cout,).  Returns (N, H*W*num_anchors, 10), matching the PyTorch
    conv1x1 -> permute(0,2,3,1) -> view(N, -1, 10)."""
    N, Cin, H, W = x_nchw.shape
    Cout = int(bias.shape[0])
    assert Cout == num_anchors * 10
    HW = H * W
    out_dtype = x_nchw.dtype

    # Glue (free / tiny): flatten spatial in native NCHW layout; reshape params.
    x = x_nchw.reshape(N, Cin, HW)
    w = weight.reshape(Cout, Cin)
    b = bias.reshape(1, Cout).astype(jnp.float32)

    t_hw = _pick_hw_tile(HW, N, max_hw_tile)
    grid = (N, pl.cdiv(HW, t_hw))

    out_nhwc = pl.pallas_call(
        _landmark_head_kernel,
        out_shape=jax.ShapeDtypeStruct((N, HW, Cout), out_dtype),
        grid_spec=pltpu.PrefetchScalarGridSpec(
            num_scalar_prefetch=0,
            grid=grid,
            in_specs=[
                # batch dim squeezed out of the kernel view via None
                pl.BlockSpec((None, Cin, t_hw), lambda n, s: (n, 0, s)),
                pl.BlockSpec((Cout, Cin), lambda n, s: (0, 0)),
                pl.BlockSpec((1, Cout), lambda n, s: (0, 0)),
            ],
            out_specs=pl.BlockSpec((None, t_hw, Cout), lambda n, s: (n, s, 0)),
        ),
        compiler_params=pltpu.CompilerParams(
            dimension_semantics=("parallel", "parallel")),
    )(x, w, b)

    # Pure row-major reshape (no transpose, no extra HBM pass):
    # (N, HW, A*10) -> (N, HW*A, 10), identical ordering to PyTorch's view.
    return out_nhwc.reshape(N, HW * num_anchors, 10)


def _reference(x_nchw, weight, bias, num_anchors):
    N, _, H, W = x_nchw.shape
    w = weight.reshape(weight.shape[0], -1)
    out = jnp.einsum("nchw,oc->nhwo", x_nchw, w) + bias
    return out.reshape(N, H * W * num_anchors, 10)


if __name__ == "__main__":
    num_anchors = 3
    Cout = num_anchors * 10
    key = jax.random.PRNGKey(0)

    # --- Test 1: small shape, whole-image spatial block ----------------------
    N, Cin, H, W = 2, 64, 8, 8
    k1, k2, k3, key = jax.random.split(key, 4)
    x = jax.random.normal(k1, (N, Cin, H, W), dtype=jnp.float32)
    weight = jax.random.normal(k2, (Cout, Cin), dtype=jnp.float32) * 0.05
    bias = jax.random.normal(k3, (Cout,), dtype=jnp.float32) * 0.01

    out = jax.block_until_ready(
        landmark_head_forward(x, weight, bias, num_anchors=num_anchors))
    ref = _reference(x, weight, bias, num_anchors)
    assert out.shape == (N, H * W * num_anchors, 10)
    assert jnp.allclose(out, ref, atol=1e-4, rtol=1e-4)

    # --- Test 2: non-divisible spatial extent (HW=400), cdiv grid + tail ----
    H2, W2 = 20, 20
    k1, k2, k3, key = jax.random.split(key, 4)
    x2 = jax.random.normal(k1, (N, Cin, H2, W2), dtype=jnp.float32)
    w2 = jax.random.normal(k2, (Cout, Cin), dtype=jnp.float32) * 0.05
    b2 = jax.random.normal(k3, (Cout,), dtype=jnp.float32) * 0.01

    out2 = jax.block_until_ready(
        landmark_head_forward(x2, w2, b2, num_anchors=num_anchors,
                              max_hw_tile=256))  # force tiles of 256 + masked tail
    ref2 = _reference(x2, w2, b2, num_anchors)
    assert out2.shape == (N, H2 * W2 * num_anchors, 10)
    assert jnp.allclose(out2, ref2, atol=1e-4, rtol=1e-4)

    # --- Test 3: N=1 inference path (v7x 2-TC split -> grid (1, 2)) ---------
    H3, W3 = 16, 16
    k1, k2, k3, key = jax.random.split(key, 4)
    x3 = jax.random.normal(k1, (1, Cin, H3, W3), dtype=jnp.float32)
    w3 = jax.random.normal(k2, (Cout, Cin), dtype=jnp.float32) * 0.05
    b3 = jax.random.normal(k3, (Cout,), dtype=jnp.float32) * 0.01

    out3 = jax.block_until_ready(
        landmark_head_forward(x3, w3, b3, num_anchors=num_anchors))
    ref3 = _reference(x3, w3, b3, num_anchors)
    assert out3.shape == (1, H3 * W3 * num_anchors, 10)
    assert jnp.allclose(out3, ref3, atol=1e-4, rtol=1e-4)

    print("KERNEL_OK")
</pallas_src>

<mosaic_0001>
module attributes {stable_mosaic.version = 11 : i64} {
  func.func @_landmark_head_kernel(%arg0: i32, %arg1: i32, %arg2: memref<1x64x64xf32, #tpu.memory_space<vmem>>, %arg3: memref<30x64xf32, #tpu.memory_space<vmem>>, %arg4: memref<1x30xf32, #tpu.memory_space<vmem>>, %arg5: memref<1x64x30xf32, #tpu.memory_space<vmem>>) attributes {dimension_semantics = [#tpu.dimension_semantics<parallel>, #tpu.dimension_semantics<parallel>], iteration_bounds = array<i64: 2, 1>, scalar_prefetch = 0 : i64, scratch_operands = 0 : i64, tpu.core_type = #tpu.core_type<tc>, window_params = [{transform_indices = @transform_0, window_bounds = array<i64: 1, 64, 64>}, {pipeline_mode = #tpu.pipeline_mode<synchronous>, transform_indices = @transform_1, window_bounds = array<i64: 30, 64>}, {pipeline_mode = #tpu.pipeline_mode<synchronous>, transform_indices = @transform_2, window_bounds = array<i64: 1, 30>}, {transform_indices = @transform_3, window_bounds = array<i64: 1, 64, 30>}]} {
    %c0 = arith.constant 0 : index
    %c0_0 = arith.constant 0 : index
    %c0_1 = arith.constant 0 : index
    %0 = vector.load %arg2[%c0, %c0_0, %c0_1] : memref<1x64x64xf32, #tpu.memory_space<vmem>>, vector<1x64x64xf32>
    %1 = vector.shape_cast %0 : vector<1x64x64xf32> to vector<64x64xf32>
    %c0_2 = arith.constant 0 : index
    %c0_3 = arith.constant 0 : index
    %2 = vector.load %arg3[%c0_2, %c0_3] : memref<30x64xf32, #tpu.memory_space<vmem>>, vector<30x64xf32>
    %cst = arith.constant dense<0.000000e+00> : vector<64x30xf32>
    %3 = tpu.matmul %1, %2, %cst {dimension_numbers = #tpu.dot_dimension_numbers<[0], [1], [1], [0], [0, 1, 1, 0], [], []>} : vector<64x64xf32>, vector<30x64xf32>, vector<64x30xf32> -> vector<64x30xf32>
    %c0_4 = arith.constant 0 : index
    %c0_5 = arith.constant 0 : index
    %4 = vector.load %arg4[%c0_4, %c0_5] : memref<1x30xf32, #tpu.memory_space<vmem>>, vector<1x30xf32>
    %5 = vector.broadcast %4 : vector<1x30xf32> to vector<64x30xf32>
    %6 = arith.addf %3, %5 : vector<64x30xf32>
    %c0_6 = arith.constant 0 : index
    %c0_7 = arith.constant 0 : index
    %c0_8 = arith.constant 0 : index
    %7 = vector.load %arg5[%c0_6, %c0_7, %c0_8] : memref<1x64x30xf32, #tpu.memory_space<vmem>>, vector<1x64x30xf32>
    %8 = vector.shape_cast %7 : vector<1x64x30xf32> to vector<64x30xf32>
    %9 = vector.shape_cast %6 : vector<64x30xf32> to vector<1x64x30xf32>
    tpu.vector_store %arg5[%c0_6, %c0_7, %c0_8], %9 {strides = array<i32>} : memref<1x64x30xf32, #tpu.memory_space<vmem>>, vector<1x64x30xf32>,
    return
  }
  func.func @transform_0(%arg0: i32, %arg1: i32) -> (i32, i32, i32) {
    %c0_i32 = arith.constant 0 : i32
    %c0_i32_0 = arith.constant 0 : i32
    return %arg0, %c0_i32, %arg1 : i32, i32, i32
  }
  func.func @transform_1(%arg0: i32, %arg1: i32) -> (i32, i32) {
    %c0_i32 = arith.constant 0 : i32
    %c0_i32_0 = arith.constant 0 : i32
    %c0_i32_1 = arith.constant 0 : i32
    return %c0_i32, %c0_i32_0 : i32, i32
  }
  func.func @transform_2(%arg0: i32, %arg1: i32) -> (i32, i32) {
    %c0_i32 = arith.constant 0 : i32
    %c0_i32_0 = arith.constant 0 : i32
    %c0_i32_1 = arith.constant 0 : i32
    return %c0_i32, %c0_i32_0 : i32, i32
  }
  func.func @transform_3(%arg0: i32, %arg1: i32) -> (i32, i32, i32) {
    %c0_i32 = arith.constant 0 : i32
    %c0_i32_0 = arith.constant 0 : i32
    return %arg0, %arg1, %c0_i32 : i32, i32, i32
  }
}

</mosaic_0001>

<bundles_post_ra>
// kernel: tpu_custom_call.1
= control target key start
LH: loop header
LB: loop body
LE: loop exit
PB: predicated region body
PF: predicated region fallthrough
CT: control target
= control target key end

     0   :  { %8 = vsyncpa [#allocation3], 0  ;;  %s1038_s0 = inlined_call_operand.hbm [shape: f32[2,64,64], index: 0, kind: input, shape index: {}]   ;;  %s1039_s1 = inlined_call_operand.hbm [shape: f32[30,64], index: 1, kind: input, shape index: {}]   ;;  %s1040_s2 = inlined_call_operand.vmem [shape: f32[1,30], index: 2, kind: input, shape index: {}]   ;;  %s1041_s3 = inlined_call_operand.vmem [shape: f32[2,64,30], index: 3, kind: output, shape index: {}]  }
   0x1   :  { %10 = vsyncpa [#allocation3 + $0x1], 0 }
   0x2   :  { %11 = vsyncpa [#allocation5], 0  ;;  %s823_s12 = smov 0   ;;  %s825_s13 = smov 0  }
   0x3   :  { %s827_s14 = smov 0   ;;  %s829_s15 = smov 0  }
   0x4   :  { %s831_s16 = smov 0   ;;  %s833_s17 = smov 0  }
   0x5 LB: > { %s538_s18 = sadd.s32 4294967295, %s797_s17   ;;  %p51_p0 = scmp.ne.s32.totalorder %s781_s13, %s777_s12  ;;  %s797_s17 = sphi %s833_s17, %s17_s17   ;;  %s793_s16 = sphi %s831_s16, %s1060_s16   ;;  %s789_s15 = sphi %s829_s15, %s1059_s15   ;;  %s785_s14 = sphi %s827_s14, %s1058_s14   ;;  %s781_s13 = sphi %s825_s13, %s1057_s13   ;;  %s777_s12 = sphi %s823_s12, %s1056_s12  }
   0x6   : > { %p853_p1 = scmp.eq.s32.totalorder %s538_s18, 0  ;;  %p540_p2 = scmp.ge.s32.totalorder %s797_s17, 1 }
   0x7   : > { %p132_p3 = scmp.lt.s32.totalorder %s797_s17, 3  ;;  %s799_s22 = smov [#allocation4]  }
   0x8   : > { %s1046_s19 = scalar_select %p853_p1, 1, 0 }
   0x9   : > { %p861_p4 = por %p853_p1, %p51_p0  ;;  %p865_p5 = pnand %p540_p2, %p132_p3 }
   0xa   : > { %s144_s23 = sshll.u32 %s799_s22, 4  ;;  %s29_s25 = sadd.s32 1, %s793_s16  ;;  %s145_s23 = int_to_ptr.vmem [resolvable:$true] %s144_s23 }
   0xb   : > { %s1047_s20 = scalar_select %p861_p4, 1, 0 }
   0xc   : > { %s1048_s21 = scalar_select %p865_p5, 1, 0 }
   0xd   : > { %p622_p6 = pneg %p865_p5  ;;  %s685_s28 = scalar_lea.hbm %s1039_s1, 512 }
   0xe   : > { %p686_p8 = scmp.ne.s32.totalorder %s1039_s1, %s685_s28  ;;  %p692_p12 = scmp.lt.u32.totalorder %s685_s28, %s1039_s1 }
   0xf   : > { %p873_p7 = pnand %p622_p6, %p853_p1 }
  0x11   : > { %p687_p9 = pneg %p873_p7 }
  0x13   : > { %p688_p10 = pnand %p687_p9, %p686_p8 }
  0x15   : > { %p689_p11 = pneg %p688_p10 }
  0x17   : > { %p694_p13 = pnand %p692_p12, %p689_p11 }
  0x19   : > { %697 = shalt.err (!%p694_p13)
}
  0x1a   : > { %s698_s6 = scalar_lea.vmem %s145_s23, 512  ;;  %p706_p6 = scmp.lt.s32.totalorder %s145_s23, %s145_s23 }
  0x1b   : > { %p699_p0 = scmp.ne.s32.totalorder %s145_s23, %s698_s6  ;;  %p707_p1 = scmp.lt.s32.totalorder %s698_s6, %s698_s6 }
  0x1d   : > { %p701_p2 = pnand %p699_p0, %p687_p9  ;;  %p708_p4 = por %p707_p1, %p706_p6 }
  0x1f   : > { %p702_p3 = pneg %p701_p2 }
  0x21   : > { %p709_p5 = pnand %p708_p4, %p702_p3 }
  0x23   : > { %712 = shalt.err (!%p709_p5)
}
  0x24   : > { %s800_s7 = smov 128   ;;  %s801_s8 = smov 8  }
  0x25   : > { %625 = dma.hbm_to_vmem [thread:$0]  (!%p873_p7), %s1039_s1, 512, %s145_s23, [#allocation5], %s800_s7, %s800_s7, %s801_s8  }
  0x26   : > { %p31_p1 = scmp.ge.s32.totalorder %s29_s25, 2  ;;  %s38_s11 = sadd.s32 1, %s785_s14 }
  0x27   : > { %p45_p4 = scmp.ne.s32.totalorder %s785_s14, %s781_s13  ;;  %p46_p5 = scmp.eq.s32.totalorder %s797_s17, 0 }
  0x28   : > { %s1062_s25 = smov (%p31_p1, %s29_s25), 0  ;;  %p631_p9 = scmp.lt.s32.totalorder %s797_s17, 2 }
  0x29   : > { %p47_p8 = por %p46_p5, %p45_p4  ;;  %s33_s12 = ssub.s32 %s793_s16, %s1062_s25 }
  0x2a   : > { %s161_s18 = sand.u32 1, %s785_s14   ;;  %p36_p10 = scmp.eq.s32.totalorder %s33_s12, 0 }
  0x2b   : > { %s543_s22 = sshll.u32 %s161_s18, 6  ;;  %s566_s24 = sshll.u32 %s793_s16, 10 }
  0x2c   : > { %s909_s26 = scalar_select %p36_p10, %s785_s14, %s38_s11  }
  0x2d   : > { %s914_s23 = scalar_lea.hbm %s1038_s0, %s566_s24  ;;  %s165_s29 = scalar_lea.vmem [#allocation2], %s543_s22 }
  0x2e   : > { %s173_s30 = sshll.u32 %s165_s29, 4  ;;  %p916_p7 = pnand %p631_p9, %p47_p8  ;;  %s920_s30 = int_to_ptr.vmem [resolvable:$true] %s173_s30 }
  0x2f   : > { %s922_s5 = scalar_lea.sflag [#allocation3], %s161_s18  ;;  %s713_s6 = scalar_lea.hbm %s914_s23, 1024 }
  0x30   : > { %p714_p11 = scmp.ne.s32.totalorder %s914_s23, %s713_s6  ;;  %p715_p12 = pneg %p916_p7 }
  0x31   : > { %s718_s11 = scalar_lea.hbm %s1038_s0, 2048  ;;  %p719_p2 = scmp.lt.u32.totalorder %s914_s23, %s1038_s0 }
  0x32   : > { %p716_p13 = pnand %p715_p12, %p714_p11  ;;  %p720_p3 = scmp.lt.u32.totalorder %s718_s11, %s713_s6 }
  0x33   : > { %p722_p1 = scmp.lt.u32.totalorder %s713_s6, %s914_s23 }
  0x34   : > { %p717_p0 = pneg %p716_p13  ;;  %p721_p6 = por %p720_p3, %p719_p2 }
  0x36   : > { %p723_p4 = por %p722_p1, %p721_p6 }
  0x38   : > { %p724_p5 = pnand %p723_p4, %p717_p0 }
  0x3a   : > { %727 = shalt.err (!%p724_p5)
}
  0x3b   : > { %s728_s18 = scalar_lea.vmem %s920_s30, 1024  ;;  %s802_s24 = smov [#allocation2]  }
  0x3c   : > { %p729_p8 = scmp.ne.s32.totalorder %s920_s30, %s728_s18  ;;  %s733_s27 = sshll.u32 %s802_s24, 4  ;;  %s734_s27 = int_to_ptr.vmem [resolvable:$false] %s733_s27 }
  0x3d   : > { %s735_s28 = scalar_lea.vmem %s734_s27, 2048  ;;  %p736_p11 = scmp.lt.s32.totalorder %s920_s30, %s734_s27 }
  0x3e   : > { %p731_p9 = pnand %p729_p8, %p715_p12  ;;  %p737_p13 = scmp.lt.s32.totalorder %s735_s28, %s728_s18 }
  0x40   : > { %p732_p10 = pneg %p731_p9  ;;  %p738_p2 = por %p737_p13, %p736_p11 }
  0x42   : > { %p739_p3 = pnand %p738_p2, %p732_p10 }
  0x44   : > { %742 = shalt.err (!%p739_p3)
}
  0x45   : > { %629 = dma.hbm_to_vmem [thread:$0]  (!%p916_p7), %s914_s23, 1024, %s920_s30, %s922_s5, %s800_s7, %s800_s7, %s801_s8  }
  0x46   : > { %p1051_p12 = scmp.ne.s32.totalorder %s1048_s21, 0 }
  0x47   : > { %s187_s29 = sand.u32 (!%p1051_p12), 1, %s781_s13   ;;  %p1052_p0 = scmp.ne.s32.totalorder (!%p1051_p12), %s1047_s20, 0 }
  0x48   : > { %185 = sbr.rel (%p1051_p12) target bundleno = 457 (0x1c9), region = 32  ;;  %s547_s6 = sshll.u32 (!%p1051_p12), %s187_s29, 6 }
  0x49   : > { %s188_s9 = scalar_lea.sflag (!%p1051_p12), [#allocation3], %s187_s29  ;;  %s956_s10 = scalar_lea.vmem (!%p1051_p12), [#allocation2], %s547_s6 }
  0x4f   : > { %768 = dma.done.wait (%p1052_p0), %s188_s9, 1024  }
  0x50   : > { %770 = vsyncadd (%p1052_p0), %s188_s9, 4294966272  ;;  %p1053_p6 = scmp.ne.s32.totalorder %s1046_s19, 0 }
  0x52   : > { %772 = dma.done.wait (%p1053_p6), [#allocation5], 512  }
  0x53   : > { %774 = vsyncadd (%p1053_p6), [#allocation5], 4294966784  ;;  %vm283_vm0 = vcmask 523264   ;;  %v232_v0 = vld [vmem:[%s956_s10] sm:$0xff]  ;;  %v233_v1 = vld [vmem:[%s956_s10 + $0x8] sm:$0xff]  ;;  %p223_p7 = scmp.lt.s32.totalorder %s789_s15, 1 }
  0x54   : > { %251 = vxpose.xlu0.b32.start [1/8] (short) (narrow) %v232_v0, 64  ;;  %v240_v2 = vld [vmem:[#allocation4] sm:$0xff]  ;;  %vm970_vm1 = vmpackc.low %vm283_vm0, %vm283_vm0  ;;  %v241_v4 = vld [vmem:[#allocation4 + $0x8] sm:$0xff]  ;;  %vm425_vm2 = vcmask 244736  }
  0x55   : > { %v242_v5 = vld [vmem:[#allocation4 + $0x10] sm:$0xff]  ;;  %v243_v6 = vld [vmem:[#allocation4 + $0x18] sm:$0x3f]  ;;  %v600_v7 = vpack.c.bf16 %v241_v4, %v240_v2  ;;  %v236_v11 = vld [vmem:[%s956_s10 + $0x20] sm:$0xff]  ;;  %s1064_s15 = smov (!%p223_p7, %s789_s15), 1 }
  0x56   : > { %v606_v8 = vpack.c.bf16 %v243_v6, %v242_v5  ;;  %v234_v9 = vld [vmem:[%s956_s10 + $0x10] sm:$0xff]  ;;  %v235_v10 = vld [vmem:[%s956_s10 + $0x18] sm:$0xff]  ;;  %v237_v12 = vld [vmem:[%s956_s10 + $0x28] sm:$0xff]  ;;  %s567_s19 = sshll.u32 %s1064_s15, 6 }
  0x57   : > { %602 = vmatprep.subr.msk.bf16.mxu0 %vm970_vm1, %v600_v7  ;;  %612 = vmatprep.subr.msk.bf16.mxu1 %vm970_vm1, %v600_v7  ;;  %v238_v13 = vld [vmem:[%s956_s10 + $0x30] sm:$0xff]  ;;  %v239_v14 = vld [vmem:[%s956_s10 + $0x38] sm:$0xff]  ;;  %v551_v23 = vld [vmem:[%s1040_s2] ss:$0 sm:$0xff]  ;;  %s230_s23 = scalar_lea.vmem %s1041_s3, %s567_s19 }
  0x58   : > { %252 = vxpose.xlu0.b32.cont [2/8] (short) (narrow) %v233_v1, 64  ;;  %605 = vmatpush3.bf16.xpose.msk.msra.mxu0 %vm970_vm1, %v600_v7 }
  0x59   : > { %614 = vmatpush3.bf16.xpose.msk.msra.mxu1 %vm970_vm1, %v600_v7  ;;  %608 = vmatprep.subr.msk.bf16.mxu0 %vm970_vm1, %v606_v8 }
  0x5a   : > { %613 = vmatprep.subr.msk.bf16.mxu1 %vm970_vm1, %v606_v8 }
  0x5c   : > { %253 = vxpose.xlu0.b32.cont [3/8] (short) (narrow) %v234_v9, 64 }
  0x60   : > { %254 = vxpose.xlu0.b32.cont [4/8] (short) (narrow) %v235_v10, 64  ;;  %611 = vmatpush3.bf16.xpose.msk.msra.mxu0 %vm970_vm1, %v606_v8 }
  0x61   : > { %615 = vmatpush3.bf16.xpose.msk.msra.mxu1 %vm970_vm1, %v606_v8 }
  0x64   : > { %255 = vxpose.xlu0.b32.cont [5/8] (short) (narrow) %v236_v11, 64 }
  0x68   : > { %256 = vxpose.xlu0.b32.cont [6/8] (short) (narrow) %v237_v12, 64 }
  0x6c   : > { %257 = vxpose.xlu0.b32.cont [7/8] (short) (narrow) %v238_v13, 64 }
  0x70   : > { %258 = vxpose.xlu0.b32.end [8/8] (short) (narrow) %v239_v14, 64 }
  0xd4   : > { %v267_v15 = vpop.trf.xlu0 }
  0xd5   : > { %588 = vmatprep.mubr.msk.f32.mxu0 %vm283_vm0, %v267_v15 }
  0xd8   : > { %v268_v16 = vpop.trf.xlu0 }
  0xd9   : > { %589 = vmatmul.mubr.msk.f32.vlgmr.msra.gmra.mrb[0].mxu0 %vm283_vm0, %v268_v16 }
  0xdc   : > { %v269_v17 = vpop.trf.xlu0 }
  0xdd   : > { %591 = vmatprep.mubr.msk.f32.mxu0 %vm283_vm0, %v269_v17 }
  0xe0   : > { %v270_v18 = vpop.trf.xlu0 }
  0xe1   : > { %592 = vmatmul.mubr.msk.f32.gmra.mrb[2].mxu0 %vm283_vm0, %v270_v18 }
  0xe4   : > { %v271_v19 = vpop.trf.xlu0 }
  0xe5   : > { %594 = vmatprep.mubr.msk.f32.mxu1 %vm283_vm0, %v271_v19 }
  0xe8   : > { %v272_v20 = vpop.trf.xlu0 }
  0xe9   : > { %595 = vmatmul.mubr.msk.f32.vlgmr.msra.gmra.mrb[0].mxu1 %vm283_vm0, %v272_v20 }
  0xec   : > { %v273_v21 = vpop.trf.xlu0 }
  0xed   : > { %597 = vmatprep.mubr.msk.f32.mxu1 %vm283_vm0, %v273_v21 }
  0xf0   : > { %v274_v22 = vpop.trf.xlu0 }
  0xf1   : > { %598 = vmatmul.mubr.msk.f32.gmra.mrb[2].mxu1 %vm283_vm0, %v274_v22 }
 0x1ac   : > { %v590_v24 = vpop.f32.mrb[0].mxu0 }
 0x1ad   : > { %v392_v25 = vadd.f32 %v590_v24, %v551_v23  ;;  %v386_v26 = vpop.f32.mrb[1].mxu0 }
 0x1ae   : > { %v387_v27 = vadd.f32 %v551_v23, %v386_v26 }
 0x1af   : > { %427 = vst.msk [vmem:[%s230_s23 + $0x8] sm:$0xff] %vm425_vm2, %v392_v25 }
 0x1b0   : > { %426 = vst.msk [vmem:[%s230_s23] sm:$0xff] %vm425_vm2, %v387_v27 }
 0x1b4   : > { %v593_v28 = vpop.f32.mrb[2].mxu0 }
 0x1b5   : > { %v402_v29 = vadd.f32 %v593_v28, %v551_v23  ;;  %v396_v30 = vpop.f32.mrb[3].mxu0 }
 0x1b6   : > { %v397_v31 = vadd.f32 %v551_v23, %v396_v30 }
 0x1b7   : > { %429 = vst.msk [vmem:[%s230_s23 + $0x18] sm:$0xff] %vm425_vm2, %v402_v29 }
 0x1b8   : > { %428 = vst.msk [vmem:[%s230_s23 + $0x10] sm:$0xff] %vm425_vm2, %v397_v31 }
 0x1bc   : > { %v596_v32 = vpop.f32.mrb[0].mxu1 }
 0x1bd   : > { %v412_v33 = vadd.f32 %v596_v32, %v551_v23  ;;  %v406_v34 = vpop.f32.mrb[1].mxu1 }
 0x1be   : > { %v407_v35 = vadd.f32 %v551_v23, %v406_v34 }
 0x1bf   : > { %431 = vst.msk [vmem:[%s230_s23 + $0x28] sm:$0xff] %vm425_vm2, %v412_v33 }
 0x1c0   : > { %430 = vst.msk [vmem:[%s230_s23 + $0x20] sm:$0xff] %vm425_vm2, %v407_v35 }
 0x1c4   : > { %v599_v36 = vpop.f32.mrb[2].mxu1 }
 0x1c5   : > { %v422_v37 = vadd.f32 %v599_v36, %v551_v23  ;;  %v416_v38 = vpop.f32.mrb[3].mxu1 }
 0x1c6   : > { %v417_v39 = vadd.f32 %v551_v23, %v416_v38 }
 0x1c7   : > { %433 = vst.msk [vmem:[%s230_s23 + $0x38] sm:$0xff] %vm425_vm2, %v422_v37 }
 0x1c8   : > { %432 = vst.msk [vmem:[%s230_s23 + $0x30] sm:$0xff] %vm425_vm2, %v417_v39 }
 0x1c9 PF: > { %s17_s17 = sadd.s32 1, %s797_s17   ;;  %s1056_s12 = smov %s781_s13 }
 0x1ca   : > { %p14_p1 = scmp.ge.s32.totalorder %s17_s17, 4   ;;  %s1057_s13 = smov %s785_s14 }
 0x1cb   : > { %s1058_s14 = smov %s909_s26  ;;  %s1059_s15 = smov %s793_s16 }
 0x1cc   : > { %s1060_s16 = smov %s1062_s25  ;;  %16 = sbr.rel (!%p14_p1) target bundleno = 5 (0x5), region = 76 }
 0x1d3   :  { %464 = vsyncpa [#allocation3], 1 }
 0x1d4   :  { %466 = vsyncpa [#allocation3 + $0x1], 1 }
 0x1d5   :  { %467 = vsyncpa [#allocation5], 1 }

</bundles_post_ra>
